<compile_context>
chip_gen: v5e
topology: v5e:2x2
jax: 0.10.0
libtpu: 0.0.40
codegen_flags: <defaults>
</compile_context>

<pallas_src>
import jax
import jax.numpy as jnp
from jax.experimental import pallas as pl
from jax.experimental.pallas import tpu as pltpu


def _mlp_kernel(x_ref, w1_ref, b1_ref, w2_ref, b2_ref, out_ref):
    """One [features, TILE_N] tile: out = W2^T @ relu(W1^T @ x + b1) + b2.

    x_ref:   VMEM (IN,  TILE_N)  feature-major, N on the lane axis
    w1_ref:  SMEM (IN,  HID)     scalar weights
    b1_ref:  SMEM (HID,)
    w2_ref:  SMEM (HID, OUT)
    b2_ref:  SMEM (OUT,)
    out_ref: VMEM (OUT, TILE_N)  lane-dense store
    """
    in_f, hid = w1_ref.shape
    _, out_f = w2_ref.shape

    # Load the IN=2 input rows once (each is a (1, TILE_N) lane-dense vector).
    xs = [x_ref[i:i + 1, :] for i in range(in_f)]

    # Layer 1 + ReLU as an unrolled VPU FMA chain (no MXU, no padding waste).
    hs = []
    for j in range(hid):
        hj = xs[0] * w1_ref[0, j]
        for i in range(1, in_f):
            hj = hj + xs[i] * w1_ref[i, j]
        hs.append(jnp.maximum(hj + b1_ref[j], 0.0))

    # Layer 2 as an unrolled VPU FMA chain.
    ys = []
    for k in range(out_f):
        yk = hs[0] * w2_ref[0, k]
        for j in range(1, hid):
            yk = yk + hs[j] * w2_ref[j, k]
        ys.append(yk + b2_ref[k])

    # Single lane-dense store of the full (OUT, TILE_N) block.
    out_ref[...] = jnp.concatenate(ys, axis=0).astype(out_ref.dtype)


def clasificador_multiclase(x, w1, b1, w2, b2, *, tile_n=512):
    """x: [N, 2] f32; w1: [2, 10]; b1: [10]; w2: [10, 3]; b2: [3] -> [N, 3]."""
    n, in_f = x.shape
    hid, out_f = w2.shape

    # Feature-major layout with N padded so the lane axis tiles cleanly.
    n_pad = ((n + 127) // 128) * 128
    tile_n = min(tile_n, n_pad)
    n_pad = ((n_pad + tile_n - 1) // tile_n) * tile_n
    x_t = jnp.zeros((in_f, n_pad), jnp.float32).at[:, :n].set(x.T)

    grid = (n_pad // tile_n,)
    smem_spec = pl.BlockSpec(memory_space=pltpu.MemorySpace.SMEM)

    cost = pl.CostEstimate(
        flops=2 * n_pad * (in_f * hid + hid * out_f),
        transcendentals=0,
        bytes_accessed=4 * (n_pad * (in_f + out_f)
                            + w1.size + b1.size + w2.size + b2.size),
    )

    out_t = pl.pallas_call(
        _mlp_kernel,
        out_shape=jax.ShapeDtypeStruct((out_f, n_pad), jnp.float32),
        grid=grid,
        in_specs=[
            pl.BlockSpec((in_f, tile_n), lambda i: (0, i)),  # x tile (VMEM)
            smem_spec,  # w1 scalars
            smem_spec,  # b1 scalars
            smem_spec,  # w2 scalars
            smem_spec,  # b2 scalars
        ],
        out_specs=pl.BlockSpec((out_f, tile_n), lambda i: (0, i)),
        compiler_params=pltpu.CompilerParams(
            dimension_semantics=("parallel",)),
        cost_estimate=cost,
    )(x_t, w1, b1, w2, b2)

    # Back to the PyTorch [N, 3] row-major view.
    return out_t[:, :n].T


def init_params(key):
    """Deterministic params matching nn.Linear default init (U(-1/sqrt(fan_in), +))."""
    k1, k2, k3, k4 = jax.random.split(key, 4)
    in1, hid, out = 2, 10, 3
    bound1 = 1.0 / jnp.sqrt(in1)
    bound2 = 1.0 / jnp.sqrt(hid)
    # Stored as [in, out] (transpose of PyTorch's [out, in]).
    w1 = jax.random.uniform(k1, (in1, hid), jnp.float32, -bound1, bound1)
    b1 = jax.random.uniform(k2, (hid,), jnp.float32, -bound1, bound1)
    w2 = jax.random.uniform(k3, (hid, out), jnp.float32, -bound2, bound2)
    b2 = jax.random.uniform(k4, (out,), jnp.float32, -bound2, bound2)
    return w1, b1, w2, b2


if __name__ == "__main__":
    key = jax.random.PRNGKey(0)
    w1, b1, w2, b2 = init_params(key)

    # Same input data as the PyTorch script's `x`.
    x = jnp.array([[1.0, 2.0], [2.0, 1.0], [3.0, 3.0],
                   [4.0, 3.0], [5.0, 5.0], [6.0, 5.0]], dtype=jnp.float32)

    out = clasificador_multiclase(x, w1, b1, w2, b2)
    out = jax.block_until_ready(out)

    # Reference check in plain JAX.
    ref = jnp.maximum(x @ w1 + b1, 0.0) @ w2 + b2
    assert out.shape == (6, 3)
    assert jnp.allclose(out, ref, atol=1e-5, rtol=1e-5)

    # Larger batch to exercise the multi-tile grid / padding path.
    x_big = jax.random.normal(jax.random.PRNGKey(1), (700, 2), jnp.float32)
    out_big = jax.block_until_ready(
        clasificador_multiclase(x_big, w1, b1, w2, b2))
    ref_big = jnp.maximum(x_big @ w1 + b1, 0.0) @ w2 + b2
    assert out_big.shape == (700, 3)
    assert jnp.allclose(out_big, ref_big, atol=1e-4, rtol=1e-4)

    print("KERNEL_OK")
</pallas_src>

<mosaic_0001>
module attributes {stable_mosaic.version = 11 : i64} {
  func.func @_mlp_kernel(%arg0: i32, %arg1: memref<2x128xf32, #tpu.memory_space<vmem>>, %arg2: memref<2x10xf32, #tpu.memory_space<smem>>, %arg3: memref<10xf32, #tpu.memory_space<smem>>, %arg4: memref<10x3xf32, #tpu.memory_space<smem>>, %arg5: memref<3xf32, #tpu.memory_space<smem>>, %arg6: memref<3x128xf32, #tpu.memory_space<vmem>>) attributes {dimension_semantics = [#tpu.dimension_semantics<parallel>], iteration_bounds = array<i64: 1>, scalar_prefetch = 0 : i64, scratch_operands = 0 : i64, tpu.core_type = #tpu.core_type<tc>, window_params = [{transform_indices = @transform_0, window_bounds = array<i64: 2, 128>}, {transform_indices = @transform_1, window_bounds = array<i64: 2, 10>}, {transform_indices = @transform_2, window_bounds = array<i64: 10>}, {transform_indices = @transform_3, window_bounds = array<i64: 10, 3>}, {transform_indices = @transform_4, window_bounds = array<i64: 3>}, {transform_indices = @transform_5, window_bounds = array<i64: 3, 128>}]} {
    %c0 = arith.constant 0 : index
    %c0_0 = arith.constant 0 : index
    %0 = vector.load %arg1[%c0, %c0_0] : memref<2x128xf32, #tpu.memory_space<vmem>>, vector<1x128xf32>
    %c1 = arith.constant 1 : index
    %c0_1 = arith.constant 0 : index
    %1 = vector.load %arg1[%c1, %c0_1] : memref<2x128xf32, #tpu.memory_space<vmem>>, vector<1x128xf32>
    %c0_2 = arith.constant 0 : index
    %c0_3 = arith.constant 0 : index
    %2 = memref.load %arg2[%c0_2, %c0_3] : memref<2x10xf32, #tpu.memory_space<smem>>
    %3 = vector.broadcast %2 : f32 to vector<1x128xf32>
    %4 = arith.mulf %0, %3 : vector<1x128xf32>
    %c1_4 = arith.constant 1 : index
    %c0_5 = arith.constant 0 : index
    %5 = memref.load %arg2[%c1_4, %c0_5] : memref<2x10xf32, #tpu.memory_space<smem>>
    %6 = vector.broadcast %5 : f32 to vector<1x128xf32>
    %7 = arith.mulf %1, %6 : vector<1x128xf32>
    %8 = arith.addf %4, %7 : vector<1x128xf32>
    %c0_6 = arith.constant 0 : index
    %9 = memref.load %arg3[%c0_6] : memref<10xf32, #tpu.memory_space<smem>>
    %10 = vector.broadcast %9 : f32 to vector<1x128xf32>
    %11 = arith.addf %8, %10 : vector<1x128xf32>
    %cst = arith.constant 0.000000e+00 : f32
    %12 = vector.broadcast %cst : f32 to vector<1x128xf32>
    %13 = arith.maximumf %11, %12 : vector<1x128xf32>
    %c0_7 = arith.constant 0 : index
    %c1_8 = arith.constant 1 : index
    %14 = memref.load %arg2[%c0_7, %c1_8] : memref<2x10xf32, #tpu.memory_space<smem>>
    %15 = vector.broadcast %14 : f32 to vector<1x128xf32>
    %16 = arith.mulf %0, %15 : vector<1x128xf32>
    %c1_9 = arith.constant 1 : index
    %c1_10 = arith.constant 1 : index
    %17 = memref.load %arg2[%c1_9, %c1_10] : memref<2x10xf32, #tpu.memory_space<smem>>
    %18 = vector.broadcast %17 : f32 to vector<1x128xf32>
    %19 = arith.mulf %1, %18 : vector<1x128xf32>
    %20 = arith.addf %16, %19 : vector<1x128xf32>
    %c1_11 = arith.constant 1 : index
    %21 = memref.load %arg3[%c1_11] : memref<10xf32, #tpu.memory_space<smem>>
    %22 = vector.broadcast %21 : f32 to vector<1x128xf32>
    %23 = arith.addf %20, %22 : vector<1x128xf32>
    %cst_12 = arith.constant 0.000000e+00 : f32
    %24 = vector.broadcast %cst_12 : f32 to vector<1x128xf32>
    %25 = arith.maximumf %23, %24 : vector<1x128xf32>
    %c0_13 = arith.constant 0 : index
    %c2 = arith.constant 2 : index
    %26 = memref.load %arg2[%c0_13, %c2] : memref<2x10xf32, #tpu.memory_space<smem>>
    %27 = vector.broadcast %26 : f32 to vector<1x128xf32>
    %28 = arith.mulf %0, %27 : vector<1x128xf32>
    %c1_14 = arith.constant 1 : index
    %c2_15 = arith.constant 2 : index
    %29 = memref.load %arg2[%c1_14, %c2_15] : memref<2x10xf32, #tpu.memory_space<smem>>
    %30 = vector.broadcast %29 : f32 to vector<1x128xf32>
    %31 = arith.mulf %1, %30 : vector<1x128xf32>
    %32 = arith.addf %28, %31 : vector<1x128xf32>
    %c2_16 = arith.constant 2 : index
    %33 = memref.load %arg3[%c2_16] : memref<10xf32, #tpu.memory_space<smem>>
    %34 = vector.broadcast %33 : f32 to vector<1x128xf32>
    %35 = arith.addf %32, %34 : vector<1x128xf32>
    %cst_17 = arith.constant 0.000000e+00 : f32
    %36 = vector.broadcast %cst_17 : f32 to vector<1x128xf32>
    %37 = arith.maximumf %35, %36 : vector<1x128xf32>
    %c0_18 = arith.constant 0 : index
    %c3 = arith.constant 3 : index
    %38 = memref.load %arg2[%c0_18, %c3] : memref<2x10xf32, #tpu.memory_space<smem>>
    %39 = vector.broadcast %38 : f32 to vector<1x128xf32>
    %40 = arith.mulf %0, %39 : vector<1x128xf32>
    %c1_19 = arith.constant 1 : index
    %c3_20 = arith.constant 3 : index
    %41 = memref.load %arg2[%c1_19, %c3_20] : memref<2x10xf32, #tpu.memory_space<smem>>
    %42 = vector.broadcast %41 : f32 to vector<1x128xf32>
    %43 = arith.mulf %1, %42 : vector<1x128xf32>
    %44 = arith.addf %40, %43 : vector<1x128xf32>
    %c3_21 = arith.constant 3 : index
    %45 = memref.load %arg3[%c3_21] : memref<10xf32, #tpu.memory_space<smem>>
    %46 = vector.broadcast %45 : f32 to vector<1x128xf32>
    %47 = arith.addf %44, %46 : vector<1x128xf32>
    %cst_22 = arith.constant 0.000000e+00 : f32
    %48 = vector.broadcast %cst_22 : f32 to vector<1x128xf32>
    %49 = arith.maximumf %47, %48 : vector<1x128xf32>
    %c0_23 = arith.constant 0 : index
    %c4 = arith.constant 4 : index
    %50 = memref.load %arg2[%c0_23, %c4] : memref<2x10xf32, #tpu.memory_space<smem>>
    %51 = vector.broadcast %50 : f32 to vector<1x128xf32>
    %52 = arith.mulf %0, %51 : vector<1x128xf32>
    %c1_24 = arith.constant 1 : index
    %c4_25 = arith.constant 4 : index
    %53 = memref.load %arg2[%c1_24, %c4_25] : memref<2x10xf32, #tpu.memory_space<smem>>
    %54 = vector.broadcast %53 : f32 to vector<1x128xf32>
    %55 = arith.mulf %1, %54 : vector<1x128xf32>
    %56 = arith.addf %52, %55 : vector<1x128xf32>
    %c4_26 = arith.constant 4 : index
    %57 = memref.load %arg3[%c4_26] : memref<10xf32, #tpu.memory_space<smem>>
    %58 = vector.broadcast %57 : f32 to vector<1x128xf32>
    %59 = arith.addf %56, %58 : vector<1x128xf32>
    %cst_27 = arith.constant 0.000000e+00 : f32
    %60 = vector.broadcast %cst_27 : f32 to vector<1x128xf32>
    %61 = arith.maximumf %59, %60 : vector<1x128xf32>
    %c0_28 = arith.constant 0 : index
    %c5 = arith.constant 5 : index
    %62 = memref.load %arg2[%c0_28, %c5] : memref<2x10xf32, #tpu.memory_space<smem>>
    %63 = vector.broadcast %62 : f32 to vector<1x128xf32>
    %64 = arith.mulf %0, %63 : vector<1x128xf32>
    %c1_29 = arith.constant 1 : index
    %c5_30 = arith.constant 5 : index
    %65 = memref.load %arg2[%c1_29, %c5_30] : memref<2x10xf32, #tpu.memory_space<smem>>
    %66 = vector.broadcast %65 : f32 to vector<1x128xf32>
    %67 = arith.mulf %1, %66 : vector<1x128xf32>
    %68 = arith.addf %64, %67 : vector<1x128xf32>
    %c5_31 = arith.constant 5 : index
    %69 = memref.load %arg3[%c5_31] : memref<10xf32, #tpu.memory_space<smem>>
    %70 = vector.broadcast %69 : f32 to vector<1x128xf32>
    %71 = arith.addf %68, %70 : vector<1x128xf32>
    %cst_32 = arith.constant 0.000000e+00 : f32
    %72 = vector.broadcast %cst_32 : f32 to vector<1x128xf32>
    %73 = arith.maximumf %71, %72 : vector<1x128xf32>
    %c0_33 = arith.constant 0 : index
    %c6 = arith.constant 6 : index
    %74 = memref.load %arg2[%c0_33, %c6] : memref<2x10xf32, #tpu.memory_space<smem>>
    %75 = vector.broadcast %74 : f32 to vector<1x128xf32>
    %76 = arith.mulf %0, %75 : vector<1x128xf32>
    %c1_34 = arith.constant 1 : index
    %c6_35 = arith.constant 6 : index
    %77 = memref.load %arg2[%c1_34, %c6_35] : memref<2x10xf32, #tpu.memory_space<smem>>
    %78 = vector.broadcast %77 : f32 to vector<1x128xf32>
    %79 = arith.mulf %1, %78 : vector<1x128xf32>
    %80 = arith.addf %76, %79 : vector<1x128xf32>
    %c6_36 = arith.constant 6 : index
    %81 = memref.load %arg3[%c6_36] : memref<10xf32, #tpu.memory_space<smem>>
    %82 = vector.broadcast %81 : f32 to vector<1x128xf32>
    %83 = arith.addf %80, %82 : vector<1x128xf32>
    %cst_37 = arith.constant 0.000000e+00 : f32
    %84 = vector.broadcast %cst_37 : f32 to vector<1x128xf32>
    %85 = arith.maximumf %83, %84 : vector<1x128xf32>
    %c0_38 = arith.constant 0 : index
    %c7 = arith.constant 7 : index
    %86 = memref.load %arg2[%c0_38, %c7] : memref<2x10xf32, #tpu.memory_space<smem>>
    %87 = vector.broadcast %86 : f32 to vector<1x128xf32>
    %88 = arith.mulf %0, %87 : vector<1x128xf32>
    %c1_39 = arith.constant 1 : index
    %c7_40 = arith.constant 7 : index
    %89 = memref.load %arg2[%c1_39, %c7_40] : memref<2x10xf32, #tpu.memory_space<smem>>
    %90 = vector.broadcast %89 : f32 to vector<1x128xf32>
    %91 = arith.mulf %1, %90 : vector<1x128xf32>
    %92 = arith.addf %88, %91 : vector<1x128xf32>
    %c7_41 = arith.constant 7 : index
    %93 = memref.load %arg3[%c7_41] : memref<10xf32, #tpu.memory_space<smem>>
    %94 = vector.broadcast %93 : f32 to vector<1x128xf32>
    %95 = arith.addf %92, %94 : vector<1x128xf32>
    %cst_42 = arith.constant 0.000000e+00 : f32
    %96 = vector.broadcast %cst_42 : f32 to vector<1x128xf32>
    %97 = arith.maximumf %95, %96 : vector<1x128xf32>
    %c0_43 = arith.constant 0 : index
    %c8 = arith.constant 8 : index
    %98 = memref.load %arg2[%c0_43, %c8] : memref<2x10xf32, #tpu.memory_space<smem>>
    %99 = vector.broadcast %98 : f32 to vector<1x128xf32>
    %100 = arith.mulf %0, %99 : vector<1x128xf32>
    %c1_44 = arith.constant 1 : index
    %c8_45 = arith.constant 8 : index
    %101 = memref.load %arg2[%c1_44, %c8_45] : memref<2x10xf32, #tpu.memory_space<smem>>
    %102 = vector.broadcast %101 : f32 to vector<1x128xf32>
    %103 = arith.mulf %1, %102 : vector<1x128xf32>
    %104 = arith.addf %100, %103 : vector<1x128xf32>
    %c8_46 = arith.constant 8 : index
    %105 = memref.load %arg3[%c8_46] : memref<10xf32, #tpu.memory_space<smem>>
    %106 = vector.broadcast %105 : f32 to vector<1x128xf32>
    %107 = arith.addf %104, %106 : vector<1x128xf32>
    %cst_47 = arith.constant 0.000000e+00 : f32
    %108 = vector.broadcast %cst_47 : f32 to vector<1x128xf32>
    %109 = arith.maximumf %107, %108 : vector<1x128xf32>
    %c0_48 = arith.constant 0 : index
    %c9 = arith.constant 9 : index
    %110 = memref.load %arg2[%c0_48, %c9] : memref<2x10xf32, #tpu.memory_space<smem>>
    %111 = vector.broadcast %110 : f32 to vector<1x128xf32>
    %112 = arith.mulf %0, %111 : vector<1x128xf32>
    %c1_49 = arith.constant 1 : index
    %c9_50 = arith.constant 9 : index
    %113 = memref.load %arg2[%c1_49, %c9_50] : memref<2x10xf32, #tpu.memory_space<smem>>
    %114 = vector.broadcast %113 : f32 to vector<1x128xf32>
    %115 = arith.mulf %1, %114 : vector<1x128xf32>
    %116 = arith.addf %112, %115 : vector<1x128xf32>
    %c9_51 = arith.constant 9 : index
    %117 = memref.load %arg3[%c9_51] : memref<10xf32, #tpu.memory_space<smem>>
    %118 = vector.broadcast %117 : f32 to vector<1x128xf32>
    %119 = arith.addf %116, %118 : vector<1x128xf32>
    %cst_52 = arith.constant 0.000000e+00 : f32
    %120 = vector.broadcast %cst_52 : f32 to vector<1x128xf32>
    %121 = arith.maximumf %119, %120 : vector<1x128xf32>
    %c0_53 = arith.constant 0 : index
    %c0_54 = arith.constant 0 : index
    %122 = memref.load %arg4[%c0_53, %c0_54] : memref<10x3xf32, #tpu.memory_space<smem>>
    %123 = vector.broadcast %122 : f32 to vector<1x128xf32>
    %124 = arith.mulf %13, %123 : vector<1x128xf32>
    %c1_55 = arith.constant 1 : index
    %c0_56 = arith.constant 0 : index
    %125 = memref.load %arg4[%c1_55, %c0_56] : memref<10x3xf32, #tpu.memory_space<smem>>
    %126 = vector.broadcast %125 : f32 to vector<1x128xf32>
    %127 = arith.mulf %25, %126 : vector<1x128xf32>
    %128 = arith.addf %124, %127 : vector<1x128xf32>
    %c2_57 = arith.constant 2 : index
    %c0_58 = arith.constant 0 : index
    %129 = memref.load %arg4[%c2_57, %c0_58] : memref<10x3xf32, #tpu.memory_space<smem>>
    %130 = vector.broadcast %129 : f32 to vector<1x128xf32>
    %131 = arith.mulf %37, %130 : vector<1x128xf32>
    %132 = arith.addf %128, %131 : vector<1x128xf32>
    %c3_59 = arith.constant 3 : index
    %c0_60 = arith.constant 0 : index
    %133 = memref.load %arg4[%c3_59, %c0_60] : memref<10x3xf32, #tpu.memory_space<smem>>
    %134 = vector.broadcast %133 : f32 to vector<1x128xf32>
    %135 = arith.mulf %49, %134 : vector<1x128xf32>
    %136 = arith.addf %132, %135 : vector<1x128xf32>
    %c4_61 = arith.constant 4 : index
    %c0_62 = arith.constant 0 : index
    %137 = memref.load %arg4[%c4_61, %c0_62] : memref<10x3xf32, #tpu.memory_space<smem>>
    %138 = vector.broadcast %137 : f32 to vector<1x128xf32>
    %139 = arith.mulf %61, %138 : vector<1x128xf32>
    %140 = arith.addf %136, %139 : vector<1x128xf32>
    %c5_63 = arith.constant 5 : index
    %c0_64 = arith.constant 0 : index
    %141 = memref.load %arg4[%c5_63, %c0_64] : memref<10x3xf32, #tpu.memory_space<smem>>
    %142 = vector.broadcast %141 : f32 to vector<1x128xf32>
    %143 = arith.mulf %73, %142 : vector<1x128xf32>
    %144 = arith.addf %140, %143 : vector<1x128xf32>
    %c6_65 = arith.constant 6 : index
    %c0_66 = arith.constant 0 : index
    %145 = memref.load %arg4[%c6_65, %c0_66] : memref<10x3xf32, #tpu.memory_space<smem>>
    %146 = vector.broadcast %145 : f32 to vector<1x128xf32>
    %147 = arith.mulf %85, %146 : vector<1x128xf32>
    %148 = arith.addf %144, %147 : vector<1x128xf32>
    %c7_67 = arith.constant 7 : index
    %c0_68 = arith.constant 0 : index
    %149 = memref.load %arg4[%c7_67, %c0_68] : memref<10x3xf32, #tpu.memory_space<smem>>
    %150 = vector.broadcast %149 : f32 to vector<1x128xf32>
    %151 = arith.mulf %97, %150 : vector<1x128xf32>
    %152 = arith.addf %148, %151 : vector<1x128xf32>
    %c8_69 = arith.constant 8 : index
    %c0_70 = arith.constant 0 : index
    %153 = memref.load %arg4[%c8_69, %c0_70] : memref<10x3xf32, #tpu.memory_space<smem>>
    %154 = vector.broadcast %153 : f32 to vector<1x128xf32>
    %155 = arith.mulf %109, %154 : vector<1x128xf32>
    %156 = arith.addf %152, %155 : vector<1x128xf32>
    %c9_71 = arith.constant 9 : index
    %c0_72 = arith.constant 0 : index
    %157 = memref.load %arg4[%c9_71, %c0_72] : memref<10x3xf32, #tpu.memory_space<smem>>
    %158 = vector.broadcast %157 : f32 to vector<1x128xf32>
    %159 = arith.mulf %121, %158 : vector<1x128xf32>
    %160 = arith.addf %156, %159 : vector<1x128xf32>
    %c0_73 = arith.constant 0 : index
    %161 = memref.load %arg5[%c0_73] : memref<3xf32, #tpu.memory_space<smem>>
    %162 = vector.broadcast %161 : f32 to vector<1x128xf32>
    %163 = arith.addf %160, %162 : vector<1x128xf32>
    %c0_74 = arith.constant 0 : index
    %c1_75 = arith.constant 1 : index
    %164 = memref.load %arg4[%c0_74, %c1_75] : memref<10x3xf32, #tpu.memory_space<smem>>
    %165 = vector.broadcast %164 : f32 to vector<1x128xf32>
    %166 = arith.mulf %13, %165 : vector<1x128xf32>
    %c1_76 = arith.constant 1 : index
    %c1_77 = arith.constant 1 : index
    %167 = memref.load %arg4[%c1_76, %c1_77] : memref<10x3xf32, #tpu.memory_space<smem>>
    %168 = vector.broadcast %167 : f32 to vector<1x128xf32>
    %169 = arith.mulf %25, %168 : vector<1x128xf32>
    %170 = arith.addf %166, %169 : vector<1x128xf32>
    %c2_78 = arith.constant 2 : index
    %c1_79 = arith.constant 1 : index
    %171 = memref.load %arg4[%c2_78, %c1_79] : memref<10x3xf32, #tpu.memory_space<smem>>
    %172 = vector.broadcast %171 : f32 to vector<1x128xf32>
    %173 = arith.mulf %37, %172 : vector<1x128xf32>
    %174 = arith.addf %170, %173 : vector<1x128xf32>
    %c3_80 = arith.constant 3 : index
    %c1_81 = arith.constant 1 : index
    %175 = memref.load %arg4[%c3_80, %c1_81] : memref<10x3xf32, #tpu.memory_space<smem>>
    %176 = vector.broadcast %175 : f32 to vector<1x128xf32>
    %177 = arith.mulf %49, %176 : vector<1x128xf32>
    %178 = arith.addf %174, %177 : vector<1x128xf32>
    %c4_82 = arith.constant 4 : index
    %c1_83 = arith.constant 1 : index
    %179 = memref.load %arg4[%c4_82, %c1_83] : memref<10x3xf32, #tpu.memory_space<smem>>
    %180 = vector.broadcast %179 : f32 to vector<1x128xf32>
    %181 = arith.mulf %61, %180 : vector<1x128xf32>
    %182 = arith.addf %178, %181 : vector<1x128xf32>
    %c5_84 = arith.constant 5 : index
    %c1_85 = arith.constant 1 : index
    %183 = memref.load %arg4[%c5_84, %c1_85] : memref<10x3xf32, #tpu.memory_space<smem>>
    %184 = vector.broadcast %183 : f32 to vector<1x128xf32>
    %185 = arith.mulf %73, %184 : vector<1x128xf32>
    %186 = arith.addf %182, %185 : vector<1x128xf32>
    %c6_86 = arith.constant 6 : index
    %c1_87 = arith.constant 1 : index
    %187 = memref.load %arg4[%c6_86, %c1_87] : memref<10x3xf32, #tpu.memory_space<smem>>
    %188 = vector.broadcast %187 : f32 to vector<1x128xf32>
    %189 = arith.mulf %85, %188 : vector<1x128xf32>
    %190 = arith.addf %186, %189 : vector<1x128xf32>
    %c7_88 = arith.constant 7 : index
    %c1_89 = arith.constant 1 : index
    %191 = memref.load %arg4[%c7_88, %c1_89] : memref<10x3xf32, #tpu.memory_space<smem>>
    %192 = vector.broadcast %191 : f32 to vector<1x128xf32>
    %193 = arith.mulf %97, %192 : vector<1x128xf32>
    %194 = arith.addf %190, %193 : vector<1x128xf32>
    %c8_90 = arith.constant 8 : index
    %c1_91 = arith.constant 1 : index
    %195 = memref.load %arg4[%c8_90, %c1_91] : memref<10x3xf32, #tpu.memory_space<smem>>
    %196 = vector.broadcast %195 : f32 to vector<1x128xf32>
    %197 = arith.mulf %109, %196 : vector<1x128xf32>
    %198 = arith.addf %194, %197 : vector<1x128xf32>
    %c9_92 = arith.constant 9 : index
    %c1_93 = arith.constant 1 : index
    %199 = memref.load %arg4[%c9_92, %c1_93] : memref<10x3xf32, #tpu.memory_space<smem>>
    %200 = vector.broadcast %199 : f32 to vector<1x128xf32>
    %201 = arith.mulf %121, %200 : vector<1x128xf32>
    %202 = arith.addf %198, %201 : vector<1x128xf32>
    %c1_94 = arith.constant 1 : index
    %203 = memref.load %arg5[%c1_94] : memref<3xf32, #tpu.memory_space<smem>>
    %204 = vector.broadcast %203 : f32 to vector<1x128xf32>
    %205 = arith.addf %202, %204 : vector<1x128xf32>
    %c0_95 = arith.constant 0 : index
    %c2_96 = arith.constant 2 : index
    %206 = memref.load %arg4[%c0_95, %c2_96] : memref<10x3xf32, #tpu.memory_space<smem>>
    %207 = vector.broadcast %206 : f32 to vector<1x128xf32>
    %208 = arith.mulf %13, %207 : vector<1x128xf32>
    %c1_97 = arith.constant 1 : index
    %c2_98 = arith.constant 2 : index
    %209 = memref.load %arg4[%c1_97, %c2_98] : memref<10x3xf32, #tpu.memory_space<smem>>
    %210 = vector.broadcast %209 : f32 to vector<1x128xf32>
    %211 = arith.mulf %25, %210 : vector<1x128xf32>
    %212 = arith.addf %208, %211 : vector<1x128xf32>
    %c2_99 = arith.constant 2 : index
    %c2_100 = arith.constant 2 : index
    %213 = memref.load %arg4[%c2_99, %c2_100] : memref<10x3xf32, #tpu.memory_space<smem>>
    %214 = vector.broadcast %213 : f32 to vector<1x128xf32>
    %215 = arith.mulf %37, %214 : vector<1x128xf32>
    %216 = arith.addf %212, %215 : vector<1x128xf32>
    %c3_101 = arith.constant 3 : index
    %c2_102 = arith.constant 2 : index
    %217 = memref.load %arg4[%c3_101, %c2_102] : memref<10x3xf32, #tpu.memory_space<smem>>
    %218 = vector.broadcast %217 : f32 to vector<1x128xf32>
    %219 = arith.mulf %49, %218 : vector<1x128xf32>
    %220 = arith.addf %216, %219 : vector<1x128xf32>
    %c4_103 = arith.constant 4 : index
    %c2_104 = arith.constant 2 : index
    %221 = memref.load %arg4[%c4_103, %c2_104] : memref<10x3xf32, #tpu.memory_space<smem>>
    %222 = vector.broadcast %221 : f32 to vector<1x128xf32>
    %223 = arith.mulf %61, %222 : vector<1x128xf32>
    %224 = arith.addf %220, %223 : vector<1x128xf32>
    %c5_105 = arith.constant 5 : index
    %c2_106 = arith.constant 2 : index
    %225 = memref.load %arg4[%c5_105, %c2_106] : memref<10x3xf32, #tpu.memory_space<smem>>
    %226 = vector.broadcast %225 : f32 to vector<1x128xf32>
    %227 = arith.mulf %73, %226 : vector<1x128xf32>
    %228 = arith.addf %224, %227 : vector<1x128xf32>
    %c6_107 = arith.constant 6 : index
    %c2_108 = arith.constant 2 : index
    %229 = memref.load %arg4[%c6_107, %c2_108] : memref<10x3xf32, #tpu.memory_space<smem>>
    %230 = vector.broadcast %229 : f32 to vector<1x128xf32>
    %231 = arith.mulf %85, %230 : vector<1x128xf32>
    %232 = arith.addf %228, %231 : vector<1x128xf32>
    %c7_109 = arith.constant 7 : index
    %c2_110 = arith.constant 2 : index
    %233 = memref.load %arg4[%c7_109, %c2_110] : memref<10x3xf32, #tpu.memory_space<smem>>
    %234 = vector.broadcast %233 : f32 to vector<1x128xf32>
    %235 = arith.mulf %97, %234 : vector<1x128xf32>
    %236 = arith.addf %232, %235 : vector<1x128xf32>
    %c8_111 = arith.constant 8 : index
    %c2_112 = arith.constant 2 : index
    %237 = memref.load %arg4[%c8_111, %c2_112] : memref<10x3xf32, #tpu.memory_space<smem>>
    %238 = vector.broadcast %237 : f32 to vector<1x128xf32>
    %239 = arith.mulf %109, %238 : vector<1x128xf32>
    %240 = arith.addf %236, %239 : vector<1x128xf32>
    %c9_113 = arith.constant 9 : index
    %c2_114 = arith.constant 2 : index
    %241 = memref.load %arg4[%c9_113, %c2_114] : memref<10x3xf32, #tpu.memory_space<smem>>
    %242 = vector.broadcast %241 : f32 to vector<1x128xf32>
    %243 = arith.mulf %121, %242 : vector<1x128xf32>
    %244 = arith.addf %240, %243 : vector<1x128xf32>
    %c2_115 = arith.constant 2 : index
    %245 = memref.load %arg5[%c2_115] : memref<3xf32, #tpu.memory_space<smem>>
    %246 = vector.broadcast %245 : f32 to vector<1x128xf32>
    %247 = arith.addf %244, %246 : vector<1x128xf32>
    %248 = tpu.concatenate %163, %205, %247 in 0 : vector<1x128xf32>, vector<1x128xf32>, vector<1x128xf32> -> vector<3x128xf32>
    %c0_116 = arith.constant 0 : index
    %c0_117 = arith.constant 0 : index
    %249 = vector.load %arg6[%c0_116, %c0_117] : memref<3x128xf32, #tpu.memory_space<vmem>>, vector<3x128xf32>
    tpu.vector_store %arg6[%c0_116, %c0_117], %248 {strides = array<i32>} : memref<3x128xf32, #tpu.memory_space<vmem>>, vector<3x128xf32>,
    return
  }
  func.func @transform_0(%arg0: i32) -> (i32, i32) {
    %c0_i32 = arith.constant 0 : i32
    %c0_i32_0 = arith.constant 0 : i32
    return %c0_i32, %arg0 : i32, i32
  }
  func.func @transform_1(%arg0: i32) -> (i32, i32) {
    %c0_i32 = arith.constant 0 : i32
    %c0_i32_0 = arith.constant 0 : i32
    %c0_i32_1 = arith.constant 0 : i32
    return %c0_i32, %c0_i32_0 : i32, i32
  }
  func.func @transform_2(%arg0: i32) -> i32 {
    %c0_i32 = arith.constant 0 : i32
    %c0_i32_0 = arith.constant 0 : i32
    return %c0_i32 : i32
  }
  func.func @transform_3(%arg0: i32) -> (i32, i32) {
    %c0_i32 = arith.constant 0 : i32
    %c0_i32_0 = arith.constant 0 : i32
    %c0_i32_1 = arith.constant 0 : i32
    return %c0_i32, %c0_i32_0 : i32, i32
  }
  func.func @transform_4(%arg0: i32) -> i32 {
    %c0_i32 = arith.constant 0 : i32
    %c0_i32_0 = arith.constant 0 : i32
    return %c0_i32 : i32
  }
  func.func @transform_5(%arg0: i32) -> (i32, i32) {
    %c0_i32 = arith.constant 0 : i32
    %c0_i32_0 = arith.constant 0 : i32
    return %c0_i32, %arg0 : i32, i32
  }
}

</mosaic_0001>

<bundles_post_ra>
// kernel: tpu_custom_call.1
= control target key start
LH: loop header
LB: loop body
LE: loop exit
PB: predicated region body
PF: predicated region fallthrough
CT: control target
= control target key end

     0   :  { %10 = vsyncpa [#allocation4], 0  ;;  %s749_s0 = inlined_call_operand.vmem [shape: f32[2,128], index: 0, kind: input, shape index: {}]   ;;  %s750_s1 = inlined_call_operand.vmem [shape: f32[2,10], index: 1, kind: input, shape index: {}]   ;;  %s751_s2 = inlined_call_operand.vmem [shape: f32[10], index: 2, kind: input, shape index: {}]   ;;  %s752_s3 = inlined_call_operand.vmem [shape: f32[10,3], index: 3, kind: input, shape index: {}]   ;;  %s753_s4 = inlined_call_operand.vmem [shape: f32[3], index: 4, kind: input, shape index: {}]   ;;  %s754_s5 = inlined_call_operand.hbm [shape: f32[3,128], index: 5, kind: output, shape index: {}]  }
   0x1   :  { %11 = vsyncpa [#allocation6], 0 }
   0x2   :  { %12 = vsyncpa [#allocation9], 0  ;;  %s30_s20 = sshll.u32 %s751_s2, 4  ;;  %s31_s20 = int_to_ptr.vmem [resolvable:$true] %s30_s20 }
   0x3   :  { %13 = vsyncpa [#allocation3], 0  ;;  %s21_s23 = sshll.u32 %s750_s1, 4  ;;  %s485_s24 = smov [#allocation5]   ;;  %s22_s23 = int_to_ptr.vmem [resolvable:$true] %s21_s23 }
   0x4   :  { %33 = dma.vmem_to_smem %s31_s20, 16, %s485_s24, [#allocation6]  }
   0x5   :  { %s486_s25 = smov [#allocation2]   ;;  %s38_s28 = sshll.u32 %s752_s3, 4  ;;  %s39_s28 = int_to_ptr.vmem [resolvable:$true] %s38_s28 }
   0x6   :  { %24 = dma.vmem_to_smem %s22_s23, 32, %s486_s25, [#allocation4]  }
   0x7   :  { %s50_s2 = sshll.u32 %s753_s4, 4  ;;  %s487_s6 = smov [#allocation7]   ;;  %s51_s2 = int_to_ptr.vmem [resolvable:$true] %s50_s2 }
   0x8   :  { %s488_s7 = smov 128   ;;  %s489_s8 = smov 8  }
   0x9   :  { %44 = dma.vmem_to_smem %s39_s28, 256, %s487_s6, [#allocation6], %s488_s7, %s488_s7, %s489_s8  }
   0xa   :  { %s490_s1 = smov [#allocation8]  }
   0xb   :  { %53 = dma.vmem_to_smem %s51_s2, 16, %s490_s1, [#allocation9]  }
   0xc   :  { %477 = dma.done.wait [#allocation4], 32  }
   0xd   :  { %478 = vsyncadd [#allocation4], 4294967264 }
   0xe   :  { %479 = dma.done.wait [#allocation6], 272  }
   0xf   :  { %480 = vsyncadd [#allocation6], 4294967024 }
  0x10   :  { %481 = dma.done.wait [#allocation9], 16  }
  0x11   :  { %482 = vsyncadd [#allocation9], 4294967280 }
  0x12   :  { %70 = sfence }
  0x13   :  { %s73_s3 = sld [smem:[#allocation2]]  ;;  %v559_v0 = vld [vmem:[%s749_s0] sm:$0x1]  ;;  %v564_v1 = vld [vmem:[%s749_s0 + $0x1] sm:$0x1]  ;;  %vm315_vm0 = vcmask 1040384  }
  0x14   :  { %s339_s9 = sld [smem:[#allocation2 + $0x80]]  ;;  %vm317_vm1 = vcmask 1041408  }
  0x15   :  { %s534_s10 = sld [smem:[#allocation5]] }
  0x16   :  { %s340_s11 = sld [smem:[#allocation2 + $0x1]] }
  0x17   :  { %s341_s4 = sld [smem:[#allocation2 + $0x81]] }
  0x18   :  { %s536_s12 = sld [smem:[#allocation5 + $0x1]] }
  0x19   :  { %s343_s13 = sld [smem:[#allocation2 + $0x2]]  ;;  %v74_v2 = vstv %s73_s3 }
  0x1a   :  { %s344_s14 = sld [smem:[#allocation2 + $0x82]]  ;;  %v77_v3 = vstv %s339_s9  ;;  %v75_v8 = vmul.f32 %v74_v2, %v559_v0 }
  0x1b   :  { %s538_s15 = sld [smem:[#allocation5 + $0x2]]  ;;  %v78_v9 = vmul.f32 %v77_v3, %v564_v1  ;;  %v81_v17 = vstv %s534_s10 }
  0x1c   :  { %s540_s16 = sld [smem:[#allocation2 + $0x3]]  ;;  %v85_v4 = vstv %s340_s11 }
  0x1d   :  { %s542_s17 = sld [smem:[#allocation2 + $0x83]]  ;;  %v88_v5 = vstv %s341_s4  ;;  %v86_v10 = vmul.f32 %v85_v4, %v559_v0  ;;  %v79_v16 = vadd.f32 %v78_v9, %v75_v8 }
  0x1e   :  { %s544_s18 = sld [smem:[#allocation5 + $0x3]]  ;;  %v89_v11 = vmul.f32 %v88_v5, %v564_v1  ;;  %v92_v20 = vstv %s536_s12 }
  0x1f   :  { %s546_s19 = sld [smem:[#allocation2 + $0x4]]  ;;  %v96_v6 = vstv %s343_s13  ;;  %v82_v28 = vadd.f32 %v81_v17, %v79_v16 }
  0x20   :  { %s548_s20 = sld [smem:[#allocation2 + $0x84]]  ;;  %v99_v7 = vstv %s344_s14  ;;  %v97_v12 = vmul.f32 %v96_v6, %v559_v0  ;;  %v90_v18 = vadd.f32 %v89_v11, %v86_v10 }
  0x21   :  { %s550_s21 = sld [smem:[#allocation5 + $0x4]]  ;;  %v100_v13 = vmul.f32 %v99_v7, %v564_v1  ;;  %v103_v21 = vstv %s538_s15  ;;  %v616_v37 = vmax.f32 %v82_v28, 0.0 }
  0x22   :  { %s552_s22 = sld [smem:[#allocation2 + $0x5]]  ;;  %v107_v14 = vstv %s540_s16  ;;  %v93_v29 = vadd.f32 %v92_v20, %v90_v18 }
  0x23   :  { %s554_s23 = sld [smem:[#allocation2 + $0x85]]  ;;  %v110_v15 = vstv %s542_s17  ;;  %v101_v19 = vadd.f32 %v100_v13, %v97_v12  ;;  %v108_v22 = vmul.f32 %v107_v14, %v559_v0 }
  0x24   :  { %s566_s28 = sld [smem:[#allocation5 + $0x5]]  ;;  %v111_v23 = vmul.f32 %v110_v15, %v564_v1  ;;  %v114_v32 = vstv %s544_s18  ;;  %v618_v38 = vmax.f32 %v93_v29, 0.0 }
  0x25   :  { %s568_s29 = sld [smem:[#allocation2 + $0x6]]  ;;  %v118_v24 = vstv %s546_s19  ;;  %v104_v30 = vadd.f32 %v103_v21, %v101_v19 }
  0x26   :  { %s570_s30 = sld [smem:[#allocation2 + $0x86]]  ;;  %v121_v25 = vstv %s548_s20  ;;  %v112_v31 = vadd.f32 %v111_v23, %v108_v22  ;;  %v119_v33 = vmul.f32 %v118_v24, %v559_v0 }
  0x27   :  { %s574_s0 = sld [smem:[#allocation5 + $0x6]]  ;;  %v122_v34 = vmul.f32 %v121_v25, %v564_v1  ;;  %v620_v39 = vmax.f32 %v104_v30, 0.0  ;;  %v125_v48 = vstv %s550_s21 }
  0x28   :  { %s580_s2 = sld [smem:[#allocation2 + $0x7]]  ;;  %v129_v26 = vstv %s552_s22  ;;  %v115_v40 = vadd.f32 %v114_v32, %v112_v31 }
  0x29   :  { %s582_s6 = sld [smem:[#allocation2 + $0x87]]  ;;  %v132_v27 = vstv %s554_s23  ;;  %v130_v35 = vmul.f32 %v129_v26, %v559_v0  ;;  %v123_v44 = vadd.f32 %v122_v34, %v119_v33 }
  0x2a   :  { %s586_s7 = sld [smem:[#allocation5 + $0x7]]  ;;  %v133_v36 = vmul.f32 %v132_v27, %v564_v1  ;;  %v136_v49 = vstv %s566_s28  ;;  %v646_v58 = vmax.f32 %v115_v40, 0.0 }
  0x2b   :  { %s588_s8 = sld [smem:[#allocation2 + $0x8]]  ;;  %v140_v41 = vstv %s568_s29  ;;  %v126_v59 = vadd.f32 %v125_v48, %v123_v44 }
  0x2c   :  { %s591_s1 = sld [smem:[#allocation2 + $0x88]]  ;;  %v143_v42 = vstv %s570_s30  ;;  %v134_v45 = vadd.f32 %v133_v36, %v130_v35  ;;  %v141_v52 = vmul.f32 %v140_v41, %v559_v0 }
  0x2d   :  { %s597_s3 = sld [smem:[#allocation5 + $0x8]]  ;;  %v144_v53 = vmul.f32 %v143_v42, %v564_v1  ;;  %v147_v7 = vstv %s574_s0  ;;  %v665_v10 = vmax.f32 %v126_v59, 0.0 }
  0x2e   :  { %s599_s9 = sld [smem:[#allocation2 + $0x9]]  ;;  %v151_v54 = vstv %s580_s2  ;;  %v137_v60 = vadd.f32 %v136_v49, %v134_v45 }
  0x2f   :  { %s183_s10 = sld [smem:[#allocation7]]  ;;  %v154_v55 = vstv %s582_s6  ;;  %v152_v62 = vmul.f32 %v151_v54, %v559_v0  ;;  %v145_v4 = vadd.f32 %v144_v53, %v141_v52 }
  0x30   :  { %s367_s11 = sld [smem:[#allocation7 + $0x80]]  ;;  %v155_v63 = vmul.f32 %v154_v55, %v564_v1  ;;  %v672_v14 = vmax.f32 %v137_v60, 0.0  ;;  %v158_v19 = vstv %s586_s7 }
  0x31   :  { %s606_s4 = sld [smem:[#allocation7 + $0x100]]  ;;  %v162_v2 = vstv %s588_s8  ;;  %v148_v18 = vadd.f32 %v147_v7, %v145_v4 }
  0x32   :  { %s612_s12 = sld [smem:[#allocation7 + $0x180]]  ;;  %v165_v3 = vstv %s591_s1  ;;  %v163_v11 = vmul.f32 %v162_v2, %v559_v0  ;;  %v156_v15 = vadd.f32 %v155_v63, %v152_v62 }
  0x33   :  { %s614_s13 = sld [smem:[#allocation2 + $0x89]]  ;;  %v166_v12 = vmul.f32 %v165_v3, %v564_v1  ;;  %v169_v20 = vstv %s597_s3  ;;  %v702_v36 = vmax.f32 %v148_v18, 0.0 }
  0x34   :  { %s622_s14 = sld [smem:[#allocation5 + $0x9]]  ;;  %v173_v5 = vstv %s599_s9  ;;  %v159_v28 = vadd.f32 %v158_v19, %v156_v15 }
  0x35   :  { %v184_v43 = vstv %s183_s10  ;;  %s626_s15 = sld [smem:[#allocation7 + $0x200]]  ;;  %v174_v16 = vmul.f32 %v173_v5, %v559_v0 }
  0x36   :  { %v185_v46 = vmul.f32 %v184_v43, %v616_v37  ;;  %v187_v47 = vstv %s367_s11  ;;  %s629_s16 = sld [smem:[#allocation7 + $0x280]]  ;;  %v160_v49 = vmax.f32 %v159_v28, 0.0 }
  0x37   :  { %v188_v50 = vmul.f32 %v187_v47, %v618_v38  ;;  %v191_v51 = vstv %s606_s4  ;;  %s635_s17 = sld [smem:[#allocation7 + $0x300]] }
  0x38   :  { %s641_s18 = sld [smem:[#allocation7 + $0x380]]  ;;  %v192_v57 = vmul.f32 %v191_v51, %v620_v39  ;;  %v195_v61 = vstv %s612_s12 }
  0x39   :  { %v189_v56 = vadd.f32 %v188_v50, %v185_v46  ;;  %s644_s19 = sld [smem:[#allocation7 + $0x400]]  ;;  %v176_v6 = vstv %s614_s13  ;;  %v196_v9 = vmul.f32 %v195_v61, %v646_v58 }
  0x3a   :  { %s649_s20 = sld [smem:[#allocation7 + $0x1]]  ;;  %v177_v17 = vmul.f32 %v176_v6, %v564_v1  ;;  %v167_v1 = vadd.f32 %v166_v12, %v163_v11  ;;  %v180_v32 = vstv %s622_s14  ;;  %s491_s14 = smov [#allocation10]  }
  0x3b   :  { %s655_s21 = sld [smem:[#allocation7 + $0x81]]  ;;  %v193_v8 = vadd.f32 %v192_v57, %v189_v56  ;;  %v199_v13 = vstv %s626_s15  ;;  %s325_s15 = sshll.u32 %s491_s14, 4  ;;  %s326_s15 = int_to_ptr.vmem [resolvable:$true] %s325_s15 }
  0x3c   :  { %s659_s22 = sld [smem:[#allocation7 + $0x101]]  ;;  %v200_v23 = vmul.f32 %v199_v13, %v665_v10  ;;  %v203_v25 = vstv %s629_s16  ;;  %v178_v29 = vadd.f32 %v177_v17, %v174_v16  ;;  %v170_v43 = vadd.f32 %v169_v20, %v167_v1 }
  0x3d   :  { %s663_s23 = sld [smem:[#allocation7 + $0x181]]  ;;  %v197_v22 = vadd.f32 %v196_v9, %v193_v8  ;;  %v204_v41 = vmul.f32 %v203_v25, %v672_v14  ;;  %v207_v44 = vstv %s635_s17 }
  0x3e   :  { %s670_s24 = sld [smem:[#allocation7 + $0x201]]  ;;  %v181_v47 = vadd.f32 %v180_v32, %v178_v29  ;;  %v211_v50 = vstv %s641_s18  ;;  %v208_v54 = vmul.f32 %v207_v44, %v702_v36  ;;  %v171_v56 = vmax.f32 %v170_v43, 0.0  ;;  %s327_s18 = sshll.u32 %s754_s5, 4  ;;  %s328_s18 = int_to_ptr.hbm [resolvable:$true] %s327_s18 }
  0x3f   :  { %s676_s25 = sld [smem:[#allocation7 + $0x281]]  ;;  %v201_v40 = vadd.f32 %v200_v23, %v197_v22  ;;  %v212_v61 = vmul.f32 %v211_v50, %v160_v49  ;;  %v215_v7 = vstv %s644_s19 }
  0x40   :  { %v226_v21 = vstv %s649_s20  ;;  %s681_s26 = sld [smem:[#allocation7 + $0x301]]  ;;  %v182_v60 = vmax.f32 %v181_v47, 0.0  ;;  %v216_v20 = vmul.f32 %v215_v7, %v171_v56 }
  0x41   :  { %v227_v24 = vmul.f32 %v226_v21, %v616_v37  ;;  %v229_v0 = vstv %s655_s21  ;;  %s686_s27 = sld [smem:[#allocation7 + $0x381]]  ;;  %v205_v53 = vadd.f32 %v204_v41, %v201_v40 }
  0x42   :  { %s689_s28 = sld [smem:[#allocation7 + $0x480]]  ;;  %v230_v26 = vmul.f32 %v229_v0, %v618_v38  ;;  %v233_v27 = vstv %s659_s22 }
  0x43   :  { %v234_v30 = vmul.f32 %v233_v27, %v620_v39  ;;  %v237_v31 = vstv %s663_s23  ;;  %s695_s29 = sld [smem:[#allocation7 + $0x401]]  ;;  %v209_v6 = vadd.f32 %v208_v54, %v205_v53 }
  0x44   :  { %v231_v33 = vadd.f32 %v230_v26, %v227_v24  ;;  %v238_v34 = vmul.f32 %v237_v31, %v646_v58  ;;  %v241_v35 = vstv %s670_s24  ;;  %s700_s30 = sld [smem:[#allocation7 + $0x481]] }
  0x45   :  { %v245_v42 = vstv %s676_s25  ;;  %s387_s0 = sld [smem:[#allocation7 + $0x2]]  ;;  %v242_v46 = vmul.f32 %v241_v35, %v665_v10  ;;  %v213_v22 = vadd.f32 %v212_v61, %v209_v6 }
  0x46   :  { %v235_v45 = vadd.f32 %v234_v30, %v231_v33  ;;  %s388_s2 = sld [smem:[#allocation7 + $0x82]]  ;;  %v249_v48 = vstv %s681_s26  ;;  %v246_v52 = vmul.f32 %v245_v42, %v672_v14 }
  0x47   :  { %s389_s6 = sld [smem:[#allocation7 + $0x102]]  ;;  %v253_v55 = vstv %s686_s27  ;;  %v250_v59 = vmul.f32 %v249_v48, %v702_v36  ;;  %v217_v29 = vadd.f32 %v216_v20, %v213_v22 }
  0x48   :  { %v239_v51 = vadd.f32 %v238_v34, %v235_v45  ;;  %s711_s7 = sld [smem:[#allocation7 + $0x182]]  ;;  %v254_v3 = vmul.f32 %v253_v55, %v160_v49  ;;  %v219_v1 = vstv %s689_s28 }
  0x49   :  { %s715_s8 = sld [smem:[#allocation7 + $0x202]]  ;;  %v257_v62 = vstv %s695_s29  ;;  %v220_v30 = vmul.f32 %v219_v1, %v182_v60 }
  0x4a   :  { %v243_v57 = vadd.f32 %v242_v46, %v239_v51  ;;  %s718_s1 = sld [smem:[#allocation7 + $0x282]]  ;;  %v258_v12 = vmul.f32 %v257_v62, %v171_v56 }
  0x4b   :  { %v268_v63 = vstv %s387_s0  ;;  %s721_s3 = sld [smem:[#allocation7 + $0x302]]  ;;  %v221_v42 = vadd.f32 %v220_v30, %v217_v29 }
  0x4c   :  { %v247_v2 = vadd.f32 %v246_v52, %v243_v57  ;;  %v269_v4 = vmul.f32 %v268_v63, %v616_v37  ;;  %v271_v5 = vstv %s388_s2  ;;  %s724_s9 = sld [smem:[#allocation7 + $0x382]]  ;;  %v261_v37 = vstv %s700_s30 }
  0x4d   :  { %v272_v8 = vmul.f32 %v271_v5, %v618_v38  ;;  %v275_v9 = vstv %s389_s6  ;;  %s730_s10 = sld [smem:[#allocation7 + $0x402]]  ;;  %v262_v24 = vmul.f32 %v261_v37, %v182_v60 }
  0x4e   :  { %v251_v11 = vadd.f32 %v250_v59, %v247_v2  ;;  %v276_v13 = vmul.f32 %v275_v9, %v620_v39  ;;  %v279_v15 = vstv %s711_s7  ;;  %s733_s11 = sld [smem:[#allocation8 + $0x1]] }
  0x4f   :  { %v273_v16 = vadd.f32 %v272_v8, %v269_v4  ;;  %v280_v17 = vmul.f32 %v279_v15, %v646_v58  ;;  %v283_v18 = vstv %s715_s8  ;;  %s396_s4 = sld [smem:[#allocation7 + $0x482]] }
  0x50   :  { %v255_v19 = vadd.f32 %v254_v3, %v251_v11  ;;  %v287_v38 = vstv %s718_s1  ;;  %v284_v39 = vmul.f32 %v283_v18, %v665_v10  ;;  %s222_s12 = sld [smem:[#allocation8]] }
  0x51   :  { %v277_v21 = vadd.f32 %v276_v13, %v273_v16  ;;  %v291_v0 = vstv %s721_s3  ;;  %v288_v58 = vmul.f32 %v287_v38, %v672_v14  ;;  %s397_s13 = sld [smem:[#allocation8 + $0x2]] }
  0x52   :  { %v259_v23 = vadd.f32 %v258_v12, %v255_v19  ;;  %v295_v26 = vstv %s724_s9  ;;  %v292_v28 = vmul.f32 %v291_v0, %v702_v36 }
  0x53   :  { %v281_v25 = vadd.f32 %v280_v17, %v277_v21  ;;  %v299_v32 = vstv %s730_s10  ;;  %v296_v34 = vmul.f32 %v295_v26, %v160_v49 }
  0x54   :  { %v263_v31 = vadd.f32 %v262_v24, %v259_v23  ;;  %v265_v10 = vstv %s733_s11  ;;  %v300_v41 = vmul.f32 %v299_v32, %v171_v56 }
  0x55   :  { %v285_v27 = vadd.f32 %v284_v39, %v281_v25  ;;  %v303_v35 = vstv %s396_s4 }
  0x56   :  { %v266_v43 = vadd.f32 %v265_v10, %v263_v31  ;;  %v223_v44 = vstv %s222_s12  ;;  %v304_v14 = vmul.f32 %v303_v35, %v182_v60 }
  0x57   :  { %v289_v33 = vadd.f32 %v288_v58, %v285_v27  ;;  %v224_v47 = vadd.f32 %v223_v44, %v221_v42  ;;  %v307_v48 = vstv %s397_s13 }
  0x58   :  { %v310_v36 = vrot.slane %v266_v43, 7 }
  0x59   :  { %v293_v40 = vadd.f32 %v292_v28, %v289_v33 }
  0x5a   :  { %v316_v49 = vsel %vm315_vm0, %v224_v47, %v310_v36 }
  0x5b   :  { %v297_v45 = vadd.f32 %v296_v34, %v293_v40 }
  0x5d   :  { %v301_v46 = vadd.f32 %v300_v41, %v297_v45 }
  0x5f   :  { %v305_v50 = vadd.f32 %v304_v14, %v301_v46 }
  0x61   :  { %v308_v51 = vadd.f32 %v307_v48, %v305_v50 }
  0x63   :  { %v313_v52 = vrot.slane %v308_v51, 6 }
  0x65   :  { %v318_v53 = vsel %vm317_vm1, %v316_v49, %v313_v52 }
  0x66   :  { %319 = vst [vmem:[#allocation10] sm:$0x7] %v318_v53 }
  0x67   :  { %330 = dma.vmem_to_hbm [thread:$0]  %s326_s15, 64, %s328_s18, [#allocation3]  }
  0x68   :  { %483 = dma.done.wait [#allocation3], 64  }
  0x69   :  { %484 = vsyncadd [#allocation3], 4294967232 }
  0x6a   :  { %335 = vsyncpa [#allocation3], 1 }
  0x6b   :  { %336 = vsyncpa [#allocation4], 1 }
  0x6c   :  { %337 = vsyncpa [#allocation6], 1 }
  0x6d   :  { %338 = vsyncpa [#allocation9], 1 }

</bundles_post_ra>
